<compile_context>
chip_gen: v7x
topology: tpu7x:2x2x1
jax: 0.10.0
libtpu: 0.0.40
codegen_flags: <defaults>
</compile_context>

<pallas_src>
import numpy as np
import jax
import jax.numpy as jnp
from jax.experimental import pallas as pl
from jax.experimental.pallas import tpu as pltpu


# ---------------------------------------------------------------------------
# Fast path: aliased no-op (zero HBM traffic).
# ---------------------------------------------------------------------------
def _alias_noop_kernel(x_ref, o_ref):
    # Output aliases the input's HBM buffer (input_output_aliases={0: 0}), so
    # the data is already in place.  Just pin ordering on the aliased output.
    del x_ref
    pltpu.touch(o_ref)


def _identity_alias(x: jax.Array) -> jax.Array:
    return pl.pallas_call(
        _alias_noop_kernel,
        out_shape=jax.ShapeDtypeStruct(x.shape, x.dtype),
        in_specs=[pl.BlockSpec(memory_space=pl.ANY)],
        out_specs=pl.BlockSpec(memory_space=pl.ANY),
        input_output_aliases={0: 0},  # output buffer IS the input buffer
        compiler_params=pltpu.CompilerParams(has_side_effects=True),
        cost_estimate=pl.CostEstimate(flops=0, transcendentals=0,
                                      bytes_accessed=0),
    )(x)


# ---------------------------------------------------------------------------
# Fallback: tuned lane-dense tiled copy (only used if the alias path fails).
# ---------------------------------------------------------------------------
def _copy_kernel(x_ref, o_ref):
    o_ref[...] = x_ref[...]


_TILE_BYTES = 4 * 1024 * 1024  # ~4 MiB tiles -> 16 MiB double-buffered footprint
_LANE_CANDIDATES = (4096, 2048, 1024, 512, 256, 128)


def _round_down(v: int, m: int) -> int:
    return (v // m) * m


def _identity_copy(x: jax.Array) -> jax.Array:
    total = x.size
    lanes = next((c for c in _LANE_CANDIDATES if total % c == 0), None)
    if lanes is None:
        # Ragged element count: kernel the 128-divisible prefix, pass the tiny
        # tail through directly (it is an identity) — no pad, no extra pass.
        flat = x.reshape(-1)
        split = _round_down(total, 128)
        if split == 0:
            # TODO(synk): tensors with <128 elements pass through with no kernel.
            return x
        head = _identity_copy(flat[:split]).reshape(-1)
        return jnp.concatenate([head, flat[split:]]).reshape(x.shape)

    rows = total // lanes
    x2 = x.reshape(rows, lanes)
    itemsize = x2.dtype.itemsize

    # ~4 MiB tiles, rounded to a multiple of 32 rows (covers f32/bf16/int8
    # sublane packing); keep >= 2 grid steps so v7x's 2nd TensorCore has work.
    block_rows = max(_TILE_BYTES // (lanes * itemsize), 32)
    if rows >= 64:
        block_rows = min(block_rows, max(32, _round_down(rows // 2, 32)))
    block_rows = max(_round_down(block_rows, 32), 32)
    block_rows = min(block_rows, rows)  # == rows (full extent) is always legal

    spec = pl.BlockSpec((block_rows, lanes), lambda i: (i, 0))
    out2 = pl.pallas_call(
        _copy_kernel,
        out_shape=jax.ShapeDtypeStruct((rows, lanes), x2.dtype),
        grid=(pl.cdiv(rows, block_rows),),
        in_specs=[spec],
        out_specs=spec,
        input_output_aliases={0: 0},
        compiler_params=pltpu.CompilerParams(
            dimension_semantics=("parallel",),   # v7x: both TCs split rows
            vmem_limit_bytes=32 * 1024 * 1024,   # safe headroom incl. v5e default
        ),
        cost_estimate=pl.CostEstimate(
            flops=0, transcendentals=0,
            bytes_accessed=2 * x2.size * itemsize),
    )(x2)
    return out2.reshape(x.shape)


# ---------------------------------------------------------------------------
# Public wrapper.  NOTE: donates x's device buffer (the output reuses it).
# ---------------------------------------------------------------------------
_identity_alias_jit = jax.jit(_identity_alias, donate_argnums=0)
_identity_copy_jit = jax.jit(_identity_copy, donate_argnums=0)

_ALIAS_PATH_OK = True


def identity(x: jax.Array) -> jax.Array:
    """Identity forward pass (Pallas).  Donates x's buffer to the output."""
    global _ALIAS_PATH_OK
    if x.size == 0:
        return x
    if _ALIAS_PATH_OK:
        try:
            return _identity_alias_jit(x)
        except Exception:
            # Toolchain rejected the degenerate no-op kernel; fall back to the
            # near-roofline tiled copy from then on.
            _ALIAS_PATH_OK = False
    return _identity_copy_jit(x)


if __name__ == "__main__":
    key = jax.random.PRNGKey(0)
    x = jax.random.normal(key, (2, 4, 16, 16), dtype=jnp.float32)

    x_host = np.asarray(x)  # host copy: x's device buffer is donated below

    y = identity(x)
    y = jax.block_until_ready(y)

    assert y.shape == x_host.shape, (y.shape, x_host.shape)
    assert y.dtype == x_host.dtype, (y.dtype, x_host.dtype)
    assert np.array_equal(np.asarray(y), x_host), "Identity kernel output mismatch"

    print("KERNEL_OK")
</pallas_src>

<mosaic_0001>
module attributes {stable_mosaic.version = 11 : i64} {
  func.func @_alias_noop_kernel(%arg0: memref<2x4x16x16xf32, #tpu.memory_space<any>>, %arg1: memref<2x4x16x16xf32, #tpu.memory_space<any>>) attributes {dimension_semantics = [], scalar_prefetch = 0 : i64, scratch_operands = 0 : i64, tpu.core_type = #tpu.core_type<tc>} {
    return
  }
}

module attributes {stable_mosaic.version = 11 : i64} {
  func.func @_copy_kernel(%arg0: i32, %arg1: memref<1x2048xf32, #tpu.memory_space<vmem>>, %arg2: memref<1x2048xf32, #tpu.memory_space<vmem>>) attributes {dimension_semantics = [#tpu.dimension_semantics<parallel>], iteration_bounds = array<i64: 1>, scalar_prefetch = 0 : i64, scratch_operands = 0 : i64, tpu.core_type = #tpu.core_type<tc>, window_params = [{transform_indices = @transform_0, window_bounds = array<i64: 1, 2048>}, {transform_indices = @transform_1, window_bounds = array<i64: 1, 2048>}]} {
    %c0 = arith.constant 0 : index
    %c0_0 = arith.constant 0 : index
    %0 = vector.load %arg1[%c0, %c0_0] : memref<1x2048xf32, #tpu.memory_space<vmem>>, vector<1x2048xf32>
    %c0_1 = arith.constant 0 : index
    %c0_2 = arith.constant 0 : index
    %1 = vector.load %arg2[%c0_1, %c0_2] : memref<1x2048xf32, #tpu.memory_space<vmem>>, vector<1x2048xf32>
    tpu.vector_store %arg2[%c0_1, %c0_2], %0 {strides = array<i32>} : memref<1x2048xf32, #tpu.memory_space<vmem>>, vector<1x2048xf32>,
    return
  }
  func.func @transform_0(%arg0: i32) -> (i32, i32) {
    %c0_i32 = arith.constant 0 : i32
    %c0_i32_0 = arith.constant 0 : i32
    return %arg0, %c0_i32 : i32, i32
  }
  func.func @transform_1(%arg0: i32) -> (i32, i32) {
    %c0_i32 = arith.constant 0 : i32
    %c0_i32_0 = arith.constant 0 : i32
    return %arg0, %c0_i32 : i32, i32
  }
}

</mosaic_0001>

<bundles_post_ra>
// kernel: _identity_alias.1
= control target key start
LH: loop header
LB: loop body
LE: loop exit
PB: predicated region body
PF: predicated region fallthrough
CT: control target
= control target key end

     0   :  { %s16_s0 = inlined_call_operand.hbm [shape: f32[2,4,16,16], index: 0, kind: input, shape index: {}, may-alias: {0,1}]   ;;  %s17_s1 = inlined_call_operand.hbm [shape: f32[2,4,16,16], index: 1, kind: output, shape index: {}, may-alias: {0,1}]  }

// kernel: _identity_copy.1
= control target key start
LH: loop header
LB: loop body
LE: loop exit
PB: predicated region body
PF: predicated region fallthrough
CT: control target
= control target key end

     0   :  { %s38_s0 = inlined_call_operand.vmem [shape: f32[1,2048], index: 0, kind: input, shape index: {}, may-alias: {0,1}]   ;;  %s39_s1 = inlined_call_operand.vmem [shape: f32[1,2048], index: 1, kind: output, shape index: {}, may-alias: {0,1}]  }
   0x1   :  { %v8_v0 = vld [vmem:[%s38_s0] sm:$0xff]  ;;  %v9_v1 = vld [vmem:[%s38_s0 + $0x8] sm:$0xff] }
   0x2   :  { %10 = vst [vmem:[%s39_s1] sm:$0xff] %v8_v0  ;;  %11 = vst [vmem:[%s39_s1 + $0x8] sm:$0xff] %v9_v1 }

</bundles_post_ra>
